<compile_context>
chip_gen: v6e
topology: v6e:2x2x1
jax: 0.10.0
libtpu: 0.0.40
codegen_flags: <defaults>
</compile_context>

<pallas_src>
import jax
import jax.numpy as jnp
from jax.experimental import pallas as pl
from jax.experimental.pallas import tpu as pltpu


def _round_up(n, m):
    return ((n + m - 1) // m) * m


def _mlp_kernel(x_ref, w1_ref, b1_ref, w2_ref, b2_ref, w3_ref, b3_ref, o_ref):
    # Cast to bf16 inside the kernel (avoids an extra wrapper-side HBM pass);
    # all matmuls accumulate in f32, bias-add/ReLU stay f32.
    x = x_ref[...].astype(jnp.bfloat16)                                  # (TM, in)
    # layer1: Linear(input_size, middle) + ReLU
    h1 = jnp.dot(x, w1_ref[...], preferred_element_type=jnp.float32)
    h1 = jnp.maximum(h1 + b1_ref[...], 0.0).astype(jnp.bfloat16)
    # layer2: Linear(middle, middle) + ReLU
    h2 = jnp.dot(h1, w2_ref[...], preferred_element_type=jnp.float32)
    h2 = jnp.maximum(h2 + b2_ref[...], 0.0).astype(jnp.bfloat16)
    # layer3: Linear(middle, output_size), no activation (matches forward())
    out = jnp.dot(h2, w3_ref[...], preferred_element_type=jnp.float32) + b3_ref[...]
    o_ref[...] = out.astype(o_ref.dtype)


def _vmem_bytes_estimate(tm, in_size, mid, out_size, out_itemsize):
    # double-buffered x / out tiles
    io = 2 * tm * (in_size * 4 + out_size * out_itemsize)
    # weights/biases (assume double-buffered even though index_maps are constant)
    weights = 2 * (2 * (in_size * mid + mid * mid + mid * out_size)
                   + 4 * (mid + mid + out_size))
    # h1/h2 temporaries in f32 + bf16, final f32 result
    temps = tm * (mid * 12 + out_size * 4)
    return io + weights + temps


def simple_nn_forward(x, params, *, tm=None, out_dtype=jnp.float32):
    """Fused forward pass of simple_nn.

    x:      [batch, input_size] (any dtype; cast like torch.as_tensor(..., float32))
    params: dict with w1 [in, mid], b1 [1, mid], w2 [mid, mid], b2 [1, mid],
            w3 [mid, out], b3 [1, out]  (weights already transposed to [in, out]).
    """
    x = jnp.asarray(x, jnp.float32)   # matches torch.as_tensor(dtype=float32); no-op if f32
    batch, in_size = x.shape
    mid = params["w1"].shape[1]
    out_size = params["w3"].shape[1]

    # --- batch tiling -------------------------------------------------------
    # Small batches: one full-extent block (legal regardless of /8 divisibility).
    # Large batches: big MXU-aligned tiles (amortize ~0.35us/step overhead) but
    # keep >=4 grid steps so the "parallel" axis can shard across v7x's 2 TCs.
    TM_MAX = 8192
    if tm is None:
        if batch <= 512:
            tm = batch
        else:
            tm = min(TM_MAX, _round_up(pl.cdiv(batch, 4), 512))
    grid = (pl.cdiv(batch, tm),)      # ragged tail block handled by Pallas

    # --- bf16 weights (native MXU path), f32 biases -------------------------
    w1 = params["w1"].astype(jnp.bfloat16)
    w2 = params["w2"].astype(jnp.bfloat16)
    w3 = params["w3"].astype(jnp.bfloat16)
    b1 = params["b1"].astype(jnp.float32)
    b2 = params["b2"].astype(jnp.float32)
    b3 = params["b3"].astype(jnp.float32)

    out_itemsize = jnp.dtype(out_dtype).itemsize
    flops = 2 * batch * (in_size * mid + mid * mid + mid * out_size)
    bytes_accessed = (x.size * 4
                      + w1.size * 2 + w2.size * 2 + w3.size * 2
                      + b1.size * 4 + b2.size * 4 + b3.size * 4
                      + batch * out_size * out_itemsize)

    vmem_est = _vmem_bytes_estimate(tm, in_size, mid, out_size, out_itemsize)
    vmem_limit = int(min(max(2 * vmem_est, 8 << 20), 40 << 20))  # safe on v5e/v6e/v7x

    out = pl.pallas_call(
        _mlp_kernel,
        out_shape=jax.ShapeDtypeStruct((batch, out_size), out_dtype),
        grid=grid,
        in_specs=[
            pl.BlockSpec((tm, in_size), lambda i: (i, 0)),      # x: tiled over batch (f32)
            pl.BlockSpec((in_size, mid), lambda i: (0, 0)),     # w1: VMEM-resident
            pl.BlockSpec((1, mid), lambda i: (0, 0)),           # b1
            pl.BlockSpec((mid, mid), lambda i: (0, 0)),         # w2
            pl.BlockSpec((1, mid), lambda i: (0, 0)),           # b2
            pl.BlockSpec((mid, out_size), lambda i: (0, 0)),    # w3 (no lane padding)
            pl.BlockSpec((1, out_size), lambda i: (0, 0)),      # b3
        ],
        out_specs=pl.BlockSpec((tm, out_size), lambda i: (i, 0)),
        compiler_params=pltpu.CompilerParams(
            dimension_semantics=("parallel",),                  # megacore sharding on v7x
            vmem_limit_bytes=vmem_limit,
        ),
        cost_estimate=pl.CostEstimate(
            flops=int(flops), transcendentals=0, bytes_accessed=int(bytes_accessed)),
    )(x, w1, b1, w2, b2, w3, b3)

    return out


def init_params(key, input_size, output_size, middle_size=64):
    """Deterministic init matching torch.nn.Linear default:
    U(-1/sqrt(fan_in), 1/sqrt(fan_in)) for both weight and bias."""
    def linear(key, fan_in, fan_out):
        kw, kb = jax.random.split(key)
        bound = 1.0 / jnp.sqrt(jnp.float32(fan_in))
        w = jax.random.uniform(kw, (fan_in, fan_out), jnp.float32, -bound, bound)
        b = jax.random.uniform(kb, (1, fan_out), jnp.float32, -bound, bound)
        return w, b

    k1, k2, k3 = jax.random.split(key, 3)
    w1, b1 = linear(k1, input_size, middle_size)
    w2, b2 = linear(k2, middle_size, middle_size)
    w3, b3 = linear(k3, middle_size, output_size)
    return dict(w1=w1, b1=b1, w2=w2, b2=b2, w3=w3, b3=b3)


def _reference_f32(x, p):
    h = jnp.maximum(x @ p["w1"] + p["b1"], 0.0)
    h = jnp.maximum(h @ p["w2"] + p["b2"], 0.0)
    return h @ p["w3"] + p["b3"]


# TODO(synk): Adam optimizer / training step from the PyTorch module is out of scope
# for a forward-pass kernel (no Pallas equivalent implemented here).

if __name__ == "__main__":
    key = jax.random.PRNGKey(0)
    k_x, k_p, k_x2 = jax.random.split(key, 3)

    batch, input_size, output_size, middle_size = 8, 16, 4, 64
    x = jax.random.normal(k_x, (batch, input_size), jnp.float32)
    params = init_params(k_p, input_size, output_size, middle_size)

    # Small demo batch (single grid step, full-extent block).
    out = jax.block_until_ready(simple_nn_forward(x, params))
    ref = _reference_f32(x, params)
    assert out.shape == (batch, output_size)
    assert jnp.allclose(out, ref, atol=5e-2, rtol=5e-2), \
        f"max abs err {jnp.max(jnp.abs(out - ref))}"

    # Larger, non-multiple-of-tile batch to exercise the batch grid + ragged tail block.
    big_batch = 1037
    x2 = jax.random.normal(k_x2, (big_batch, input_size), jnp.float32)
    out2 = jax.block_until_ready(simple_nn_forward(x2, params))
    ref2 = _reference_f32(x2, params)
    assert out2.shape == (big_batch, output_size)
    assert jnp.allclose(out2, ref2, atol=5e-2, rtol=5e-2), \
        f"max abs err {jnp.max(jnp.abs(out2 - ref2))}"

    print("KERNEL_OK")
</pallas_src>

<mosaic_0001>
module attributes {stable_mosaic.version = 11 : i64} {
  func.func @_mlp_kernel(%arg0: i32, %arg1: memref<8x16xf32, #tpu.memory_space<vmem>>, %arg2: memref<16x64xbf16, #tpu.memory_space<vmem>>, %arg3: memref<1x64xf32, #tpu.memory_space<vmem>>, %arg4: memref<64x64xbf16, #tpu.memory_space<vmem>>, %arg5: memref<1x64xf32, #tpu.memory_space<vmem>>, %arg6: memref<64x4xbf16, #tpu.memory_space<vmem>>, %arg7: memref<1x4xf32, #tpu.memory_space<vmem>>, %arg8: memref<8x4xf32, #tpu.memory_space<vmem>>) attributes {dimension_semantics = [#tpu.dimension_semantics<parallel>], iteration_bounds = array<i64: 1>, scalar_prefetch = 0 : i64, scratch_operands = 0 : i64, tpu.core_type = #tpu.core_type<tc>, window_params = [{transform_indices = @transform_0, window_bounds = array<i64: 8, 16>}, {pipeline_mode = #tpu.pipeline_mode<synchronous>, transform_indices = @transform_1, window_bounds = array<i64: 16, 64>}, {pipeline_mode = #tpu.pipeline_mode<synchronous>, transform_indices = @transform_2, window_bounds = array<i64: 1, 64>}, {pipeline_mode = #tpu.pipeline_mode<synchronous>, transform_indices = @transform_3, window_bounds = array<i64: 64, 64>}, {pipeline_mode = #tpu.pipeline_mode<synchronous>, transform_indices = @transform_4, window_bounds = array<i64: 1, 64>}, {pipeline_mode = #tpu.pipeline_mode<synchronous>, transform_indices = @transform_5, window_bounds = array<i64: 64, 4>}, {pipeline_mode = #tpu.pipeline_mode<synchronous>, transform_indices = @transform_6, window_bounds = array<i64: 1, 4>}, {transform_indices = @transform_7, window_bounds = array<i64: 8, 4>}]} {
    %c0 = arith.constant 0 : index
    %c0_0 = arith.constant 0 : index
    %0 = vector.load %arg1[%c0, %c0_0] : memref<8x16xf32, #tpu.memory_space<vmem>>, vector<8x16xf32>
    %1 = arith.truncf %0 : vector<8x16xf32> to vector<8x16xbf16>
    %c0_1 = arith.constant 0 : index
    %c0_2 = arith.constant 0 : index
    %2 = vector.load %arg2[%c0_1, %c0_2] : memref<16x64xbf16, #tpu.memory_space<vmem>>, vector<16x64xbf16>
    %cst = arith.constant dense<0.000000e+00> : vector<8x64xf32>
    %3 = tpu.matmul %1, %2, %cst {dimension_numbers = #tpu.dot_dimension_numbers<[1], [0], [0], [1], [0, 0, 1, 1], [], []>} : vector<8x16xbf16>, vector<16x64xbf16>, vector<8x64xf32> -> vector<8x64xf32>
    %c0_3 = arith.constant 0 : index
    %c0_4 = arith.constant 0 : index
    %4 = vector.load %arg3[%c0_3, %c0_4] : memref<1x64xf32, #tpu.memory_space<vmem>>, vector<1x64xf32>
    %5 = vector.broadcast %4 : vector<1x64xf32> to vector<8x64xf32>
    %6 = arith.addf %3, %5 : vector<8x64xf32>
    %cst_5 = arith.constant 0.000000e+00 : f32
    %7 = vector.broadcast %cst_5 : f32 to vector<8x64xf32>
    %8 = arith.maximumf %6, %7 : vector<8x64xf32>
    %9 = arith.truncf %8 : vector<8x64xf32> to vector<8x64xbf16>
    %c0_6 = arith.constant 0 : index
    %c0_7 = arith.constant 0 : index
    %10 = vector.load %arg4[%c0_6, %c0_7] : memref<64x64xbf16, #tpu.memory_space<vmem>>, vector<64x64xbf16>
    %cst_8 = arith.constant dense<0.000000e+00> : vector<8x64xf32>
    %11 = tpu.matmul %9, %10, %cst_8 {dimension_numbers = #tpu.dot_dimension_numbers<[1], [0], [0], [1], [0, 0, 1, 1], [], []>} : vector<8x64xbf16>, vector<64x64xbf16>, vector<8x64xf32> -> vector<8x64xf32>
    %c0_9 = arith.constant 0 : index
    %c0_10 = arith.constant 0 : index
    %12 = vector.load %arg5[%c0_9, %c0_10] : memref<1x64xf32, #tpu.memory_space<vmem>>, vector<1x64xf32>
    %13 = vector.broadcast %12 : vector<1x64xf32> to vector<8x64xf32>
    %14 = arith.addf %11, %13 : vector<8x64xf32>
    %cst_11 = arith.constant 0.000000e+00 : f32
    %15 = vector.broadcast %cst_11 : f32 to vector<8x64xf32>
    %16 = arith.maximumf %14, %15 : vector<8x64xf32>
    %17 = arith.truncf %16 : vector<8x64xf32> to vector<8x64xbf16>
    %c0_12 = arith.constant 0 : index
    %c0_13 = arith.constant 0 : index
    %18 = vector.load %arg6[%c0_12, %c0_13] : memref<64x4xbf16, #tpu.memory_space<vmem>>, vector<64x4xbf16>
    %cst_14 = arith.constant dense<0.000000e+00> : vector<8x4xf32>
    %19 = tpu.matmul %17, %18, %cst_14 {dimension_numbers = #tpu.dot_dimension_numbers<[1], [0], [0], [1], [0, 0, 1, 1], [], []>} : vector<8x64xbf16>, vector<64x4xbf16>, vector<8x4xf32> -> vector<8x4xf32>
    %c0_15 = arith.constant 0 : index
    %c0_16 = arith.constant 0 : index
    %20 = vector.load %arg7[%c0_15, %c0_16] : memref<1x4xf32, #tpu.memory_space<vmem>>, vector<1x4xf32>
    %21 = vector.broadcast %20 : vector<1x4xf32> to vector<8x4xf32>
    %22 = arith.addf %19, %21 : vector<8x4xf32>
    %c0_17 = arith.constant 0 : index
    %c0_18 = arith.constant 0 : index
    %23 = vector.load %arg8[%c0_17, %c0_18] : memref<8x4xf32, #tpu.memory_space<vmem>>, vector<8x4xf32>
    tpu.vector_store %arg8[%c0_17, %c0_18], %22 {strides = array<i32>} : memref<8x4xf32, #tpu.memory_space<vmem>>, vector<8x4xf32>,
    return
  }
  func.func @transform_0(%arg0: i32) -> (i32, i32) {
    %c0_i32 = arith.constant 0 : i32
    %c0_i32_0 = arith.constant 0 : i32
    return %arg0, %c0_i32 : i32, i32
  }
  func.func @transform_1(%arg0: i32) -> (i32, i32) {
    %c0_i32 = arith.constant 0 : i32
    %c0_i32_0 = arith.constant 0 : i32
    %c0_i32_1 = arith.constant 0 : i32
    return %c0_i32, %c0_i32_0 : i32, i32
  }
  func.func @transform_2(%arg0: i32) -> (i32, i32) {
    %c0_i32 = arith.constant 0 : i32
    %c0_i32_0 = arith.constant 0 : i32
    %c0_i32_1 = arith.constant 0 : i32
    return %c0_i32, %c0_i32_0 : i32, i32
  }
  func.func @transform_3(%arg0: i32) -> (i32, i32) {
    %c0_i32 = arith.constant 0 : i32
    %c0_i32_0 = arith.constant 0 : i32
    %c0_i32_1 = arith.constant 0 : i32
    return %c0_i32, %c0_i32_0 : i32, i32
  }
  func.func @transform_4(%arg0: i32) -> (i32, i32) {
    %c0_i32 = arith.constant 0 : i32
    %c0_i32_0 = arith.constant 0 : i32
    %c0_i32_1 = arith.constant 0 : i32
    return %c0_i32, %c0_i32_0 : i32, i32
  }
  func.func @transform_5(%arg0: i32) -> (i32, i32) {
    %c0_i32 = arith.constant 0 : i32
    %c0_i32_0 = arith.constant 0 : i32
    %c0_i32_1 = arith.constant 0 : i32
    return %c0_i32, %c0_i32_0 : i32, i32
  }
  func.func @transform_6(%arg0: i32) -> (i32, i32) {
    %c0_i32 = arith.constant 0 : i32
    %c0_i32_0 = arith.constant 0 : i32
    %c0_i32_1 = arith.constant 0 : i32
    return %c0_i32, %c0_i32_0 : i32, i32
  }
  func.func @transform_7(%arg0: i32) -> (i32, i32) {
    %c0_i32 = arith.constant 0 : i32
    %c0_i32_0 = arith.constant 0 : i32
    return %arg0, %c0_i32 : i32, i32
  }
}

</mosaic_0001>

<bundles_post_ra>
// kernel: tpu_custom_call.1
= control target key start
LH: loop header
LB: loop body
LE: loop exit
PB: predicated region body
PF: predicated region fallthrough
CT: control target
= control target key end

     0   :  { %12 = vsyncpa [#allocation3], 0  ;;  %s497_s0 = inlined_call_operand.hbm [shape: f32[8,16], index: 0, kind: input, shape index: {}]   ;;  %s498_s1 = inlined_call_operand.hbm [shape: bf16[16,64], index: 1, kind: input, shape index: {}]   ;;  %s499_s2 = inlined_call_operand.vmem [shape: f32[1,64], index: 2, kind: input, shape index: {}]   ;;  %s500_s3 = inlined_call_operand.vmem [shape: bf16[64,64], index: 3, kind: input, shape index: {}]   ;;  %s501_s4 = inlined_call_operand.vmem [shape: f32[1,64], index: 4, kind: input, shape index: {}]   ;;  %s502_s5 = inlined_call_operand.vmem [shape: bf16[64,4], index: 5, kind: input, shape index: {}]   ;;  %s503_s6 = inlined_call_operand.vmem [shape: f32[1,4], index: 6, kind: input, shape index: {}]   ;;  %s504_s7 = inlined_call_operand.vmem [shape: f32[8,4], index: 7, kind: output, shape index: {}]  }
   0x1   :  { %13 = vsyncpa [#allocation5], 0  ;;  %s407_s24 = smov [#allocation2]   ;;  %s408_s26 = smov [#allocation4]  }
   0x2   :  { %s20_s25 = sshll.u32 %s407_s24, 4  ;;  %s29_s27 = sshll.u32 %s408_s26, 4  ;;  %s21_s25 = int_to_ptr.vmem [resolvable:$true] %s20_s25  ;;  %s30_s27 = int_to_ptr.vmem [resolvable:$true] %s29_s27 }
   0x3   :  { %s371_s28 = scalar_lea.vmem %s21_s25, 128  ;;  %p376_p1 = scmp.lt.s32.totalorder %s21_s25, %s21_s25 }
   0x4   :  { %p372_p0 = scmp.ne.s32.totalorder %s21_s25, %s371_s28  ;;  %p377_p2 = scmp.lt.s32.totalorder %s371_s28, %s371_s28 }
   0x6   :  { %p378_p3 = por %p377_p2, %p376_p1 }
   0x8   :  { %p379_p4 = pnand %p378_p3, %p372_p0 }
   0xa   :  { %382 = shalt.err (!%p379_p4)
}
   0xb   :  { %23 = dma.hbm_to_vmem [thread:$0]  %s497_s0, 128, %s21_s25, [#allocation3]  }
   0xc   :  { %s391_s8 = scalar_lea.vmem %s30_s27, 128  ;;  %p396_p6 = scmp.lt.s32.totalorder %s30_s27, %s30_s27 }
   0xd   :  { %p392_p5 = scmp.ne.s32.totalorder %s30_s27, %s391_s8  ;;  %p397_p7 = scmp.lt.s32.totalorder %s391_s8, %s391_s8 }
   0xf   :  { %p398_p8 = por %p397_p7, %p396_p6 }
  0x11   :  { %p399_p9 = pnand %p398_p8, %p392_p5 }
  0x13   :  { %402 = shalt.err (!%p399_p9)
}
  0x14   :  { %s409_s9 = smov 64   ;;  %s410_s10 = smov 4  }
  0x15   :  { %35 = dma.hbm_to_vmem [thread:$0]  %s498_s1, 128, %s30_s27, [#allocation5], %s409_s9, %s409_s9, %s410_s10  }
  0x16   :  { %403 = dma.done.wait [#allocation3], 128  }
  0x17   :  { %404 = vsyncadd [#allocation3], 4294967168 }
  0x18   :  { %405 = dma.done.wait [#allocation5], 128  }
  0x19   :  { %406 = vsyncadd [#allocation5], 4294967168  ;;  %v411_v0 = vmov 0.0   ;;  %vm412_vm0 = vmmov 0   ;;  %v354_v1 = vld [vmem:[#allocation4] sm:$0xff]   ;;  %v53_v2 = vld [vmem:[#allocation2] sm:$0xff] }
  0x1a   :  { %318 = vmatprep.subr.bf16.mxu0 %v411_v0  ;;  %320 = vmatprep.mubr.msk.bf16.mxu0 %vm412_vm0, %v411_v0  ;;  %v54_v3 = vpack.c.bf16 %v53_v2, %v53_v2  ;;  %vm70_vm1 = vcmask 130048   ;;  %v355_v4 = vld [vmem:[%s500_s3 + $0x18] sm:$0xff]   ;;  %v356_v5 = vld [vmem:[%s500_s3 + $0x10] sm:$0xff]   ;;  %v357_v6 = vld [vmem:[%s500_s3 + $0x8] sm:$0xff]   ;;  %vm155_vm2 = vcmask 523264   ;;  %vm283_vm3 = vcmask 31744  }
  0x1b   :  { %324 = vmatprep.subr.bf16.mxu1 %v411_v0  ;;  %332 = vmatprep.mubr.msk.bf16.mxu1 %vm412_vm0, %v411_v0  ;;  %v358_v7 = vld [vmem:[%s500_s3] sm:$0xff]   ;;  %v359_v8 = vld [vmem:[%s502_s5 + $0x18] sm:$0xff]   ;;  %v360_v9 = vld [vmem:[%s502_s5 + $0x10] sm:$0xff]  }
  0x1c   :  { %319 = vmatpush3.bf16.msra.mxu0 %v354_v1  ;;  %325 = vmatpush3.bf16.msra.mxu1 %v355_v4  ;;  %v291_v10 = vld [vmem:[%s499_s2] ss:$0 sm:$0xff]  ;;  %v361_v18 = vld [vmem:[%s502_s5 + $0x8] sm:$0xff]  }
  0x1d   :  { %336 = vmatprep.subr.bf16.mxu0 %v411_v0  ;;  %326 = vmatprep.subr.bf16.mxu1 %v411_v0  ;;  %v362_v19 = vld [vmem:[%s502_s5] sm:$0xff]  }
  0x1e   :  { %v294_v20 = vld [vmem:[%s501_s4] ss:$0 sm:$0xff] }
  0x1f   :  { %321 = vmatmul.mubr.msk.bf16.vlgmr.msra.gmra.mxu0 %vm70_vm1, %v54_v3  ;;  %v300_v28 = vld [vmem:[%s503_s6] ss:$0 sm:$0xff] }
  0x20   :  { %344 = vmatprep.mubr.msk.bf16.mxu0 %vm412_vm0, %v411_v0  ;;  %327 = vmatpush3.bf16.msra.mxu1 %v356_v5 }
  0x21   :  { %328 = vmatprep.subr.bf16.mxu1 %v411_v0  ;;  %337 = vmatpush3.bf16.msra.mxu0 %v359_v8 }
  0x22   :  { %338 = vmatprep.subr.bf16.mxu0 %v411_v0 }
  0x24   :  { %329 = vmatpush3.bf16.msra.mxu1 %v357_v6 }
  0x25   :  { %330 = vmatprep.subr.bf16.mxu1 %v411_v0  ;;  %339 = vmatpush3.bf16.msra.mxu0 %v360_v9 }
  0x26   :  { %340 = vmatprep.subr.bf16.mxu0 %v411_v0 }
  0x28   :  { %331 = vmatpush3.bf16.msra.mxu1 %v358_v7 }
  0x29   :  { %341 = vmatpush3.bf16.msra.mxu0 %v361_v18 }
  0x2a   :  { %342 = vmatprep.subr.bf16.mxu0 %v411_v0 }
  0x2d   :  { %343 = vmatpush3.bf16.msra.mxu0 %v362_v19 }
  0xdf   :  { %v108_v11 = vpop.f32.mrf.mxu0 }
  0xe0   :  { %v109_v12 = vadd.f32 %v291_v10, %v108_v11 }
  0xe1   :  { %v322_v13 = vpop.f32.mrf.mxu0 }
  0xe2   :  { %v114_v14 = vmax.f32 %v109_v12, 0.0 }
  0xe3   :  { %v111_v15 = vpop.f32.mrf.mxu0 }
  0xe4   :  { %v115_v16 = vpack.c.bf16 %v114_v14, %v114_v14 }
  0xe5   :  { %v323_v17 = vpop.f32.mrf.mxu0 }
  0xe6   :  { %333 = vmatmul.mubr.msk.bf16.vlgmr.msra.gmra.mxu1 %vm155_vm2, %v115_v16 }
 0x1a6   :  { %v193_v21 = vpop.f32.mrf.mxu1 }
 0x1a7   :  { %v194_v22 = vadd.f32 %v294_v20, %v193_v21 }
 0x1a8   :  { %v334_v23 = vpop.f32.mrf.mxu1 }
 0x1a9   :  { %v199_v24 = vmax.f32 %v194_v22, 0.0 }
 0x1aa   :  { %v196_v25 = vpop.f32.mrf.mxu1 }
 0x1ab   :  { %v200_v26 = vpack.c.bf16 %v199_v24, %v199_v24 }
 0x1ac   :  { %v335_v27 = vpop.f32.mrf.mxu1 }
 0x1ad   :  { %345 = vmatmul.mubr.msk.bf16.vlgmr.msra.gmra.mxu0 %vm155_vm2, %v200_v26 }
 0x26d   :  { %v277_v29 = vpop.f32.mrf.mxu0 }
 0x26e   :  { %v278_v30 = vadd.f32 %v300_v28, %v277_v29 }
 0x26f   :  { %v346_v31 = vpop.f32.mrf.mxu0 }
 0x270   :  { %284 = vst.msk [vmem:[%s504_s7] sm:$0xff] %vm283_vm3, %v278_v30 }
 0x271   :  { %v280_v32 = vpop.f32.mrf.mxu0 }
 0x273   :  { %v347_v33 = vpop.f32.mrf.mxu0 }
 0x274   :  { %289 = vsyncpa [#allocation3], 1 }
 0x275   :  { %290 = vsyncpa [#allocation5], 1 }

</bundles_post_ra>
